<compile_context>
chip_gen: v6e
topology: v6e:2x2x1
jax: 0.10.0
libtpu: 0.0.40
codegen_flags: <defaults>
</compile_context>

<pallas_src>
import math
import jax
import jax.numpy as jnp
from jax.experimental import pallas as pl
from jax.experimental.pallas import tpu as pltpu

LN_EPS = 1e-6


def _layer_norm_kernel(eps, d):
    inv_nm1 = 1.0 / float(d - 1)          # Bessel correction (matches torch.Tensor.std default)

    def kernel(x_ref, g_ref, b_ref, o_ref):
        x = x_ref[...]                                             # (R, D) f32
        mean = jnp.mean(x, axis=-1, keepdims=True)
        xc = x - mean
        var = jnp.sum(xc * xc, axis=-1, keepdims=True) * inv_nm1   # unbiased variance
        std = jnp.sqrt(var)
        o_ref[...] = g_ref[...] * (xc / (std + eps)) + b_ref[...]

    return kernel


def layer_norm(x, a_2, b_2, eps=LN_EPS, row_tile=256):
    """Pallas LayerNorm over the last axis, matching the PyTorch module's forward."""
    *lead, d = x.shape
    rows = int(math.prod(lead)) if lead else 1
    x2 = x.reshape(rows, d).astype(jnp.float32)
    g = a_2.reshape(1, d).astype(jnp.float32)
    b = b_2.reshape(1, d).astype(jnp.float32)
    kernel = _layer_norm_kernel(eps, d)

    if rows <= row_tile or rows % row_tile != 0:
        # Tiny / irregular case: whole slab resident in VMEM, single invocation, no grid
        # (a 2-step grid would cost more in dispatch/pipeline overhead than the compute).
        vspec = pl.BlockSpec(memory_space=pltpu.MemorySpace.VMEM)
        out = pl.pallas_call(
            kernel,
            out_shape=jax.ShapeDtypeStruct((rows, d), jnp.float32),
            in_specs=[vspec, vspec, vspec],
            out_specs=vspec,
        )(x2, g, b)
    else:
        # Larger case: row-tiled grid; rows are independent -> "parallel"
        # (lets v7x shard the grid across its two TensorCores).
        out = pl.pallas_call(
            kernel,
            out_shape=jax.ShapeDtypeStruct((rows, d), jnp.float32),
            grid=(rows // row_tile,),
            in_specs=[
                pl.BlockSpec((row_tile, d), lambda i: (i, 0)),
                pl.BlockSpec((1, d), lambda i: (0, 0)),
                pl.BlockSpec((1, d), lambda i: (0, 0)),
            ],
            out_specs=pl.BlockSpec((row_tile, d), lambda i: (i, 0)),
            compiler_params=pltpu.CompilerParams(
                dimension_semantics=("parallel",)),
        )(x2, g, b)
    return out.reshape(*lead, d)


def _reference(x, a_2, b_2, eps=LN_EPS):
    # pure-JAX reference with identical semantics (unbiased std, eps added to std)
    mean = jnp.mean(x, axis=-1, keepdims=True)
    xc = x - mean
    var = jnp.sum(xc * xc, axis=-1, keepdims=True) / (x.shape[-1] - 1)
    std = jnp.sqrt(var)
    return a_2 * xc / (std + eps) + b_2


if __name__ == "__main__":
    key = jax.random.PRNGKey(0)
    k1, k2, k3, k4 = jax.random.split(key, 4)

    # small shape consistent with the module's typical use: (batch=2, seq=8, features=32)
    B, S, D = 2, 8, 32
    x = jax.random.normal(k1, (B, S, D), jnp.float32)
    a_2 = 1.0 + 0.1 * jax.random.normal(k2, (D,), jnp.float32)   # gain  (module inits to ones)
    b_2 = 0.1 * jax.random.normal(k3, (D,), jnp.float32)         # bias  (module inits to zeros)

    out = layer_norm(x, a_2, b_2)
    jax.block_until_ready(out)
    assert out.shape == (B, S, D)
    assert bool(jnp.max(jnp.abs(out - _reference(x, a_2, b_2))) < 1e-4)

    # larger, lane-dense shape exercising the row-tiled ("parallel") grid path
    B2, S2, D2 = 4, 512, 128
    x_big = jax.random.normal(k4, (B2, S2, D2), jnp.float32)
    g_big = jnp.ones((D2,), jnp.float32)
    b_big = jnp.zeros((D2,), jnp.float32)
    out_big = layer_norm(x_big, g_big, b_big)
    jax.block_until_ready(out_big)
    assert bool(jnp.max(jnp.abs(out_big - _reference(x_big, g_big, b_big))) < 1e-4)

    print("KERNEL_OK")
</pallas_src>

<mosaic_0001>
module attributes {stable_mosaic.version = 11 : i64} {
  func.func @kernel(%arg0: memref<16x32xf32, #tpu.memory_space<vmem>>, %arg1: memref<1x32xf32, #tpu.memory_space<vmem>>, %arg2: memref<1x32xf32, #tpu.memory_space<vmem>>, %arg3: memref<16x32xf32, #tpu.memory_space<vmem>>) attributes {dimension_semantics = [], scalar_prefetch = 0 : i64, scratch_operands = 0 : i64, tpu.core_type = #tpu.core_type<tc>} {
    %c0 = arith.constant 0 : index
    %c0_0 = arith.constant 0 : index
    %0 = vector.load %arg0[%c0, %c0_0] : memref<16x32xf32, #tpu.memory_space<vmem>>, vector<16x32xf32>
    %cst = arith.constant dense<0.000000e+00> : vector<16xf32>
    %1 = vector.multi_reduction <add>, %0, %cst [1] : vector<16x32xf32> to vector<16xf32>
    %2 = vector.shape_cast %1 : vector<16xf32> to vector<16x1xf32>
    %cst_1 = arith.constant 3.200000e+01 : f32
    %3 = vector.broadcast %cst_1 : f32 to vector<16x1xf32>
    %4 = arith.divf %2, %3 : vector<16x1xf32>
    %5 = vector.broadcast %4 : vector<16x1xf32> to vector<16x32xf32>
    %6 = arith.subf %0, %5 : vector<16x32xf32>
    %7 = arith.mulf %6, %6 : vector<16x32xf32>
    %cst_2 = arith.constant dense<0.000000e+00> : vector<16xf32>
    %8 = vector.multi_reduction <add>, %7, %cst_2 [1] : vector<16x32xf32> to vector<16xf32>
    %9 = vector.shape_cast %8 : vector<16xf32> to vector<16x1xf32>
    %cst_3 = arith.constant 0.0322580636 : f32
    %10 = vector.broadcast %cst_3 : f32 to vector<16x1xf32>
    %11 = arith.mulf %9, %10 : vector<16x1xf32>
    %12 = math.sqrt %11 : vector<16x1xf32>
    %c0_4 = arith.constant 0 : index
    %c0_5 = arith.constant 0 : index
    %13 = vector.load %arg1[%c0_4, %c0_5] : memref<1x32xf32, #tpu.memory_space<vmem>>, vector<1x32xf32>
    %cst_6 = arith.constant 9.99999997E-7 : f32
    %14 = vector.broadcast %cst_6 : f32 to vector<16x1xf32>
    %15 = arith.addf %12, %14 : vector<16x1xf32>
    %16 = vector.broadcast %15 : vector<16x1xf32> to vector<16x32xf32>
    %17 = arith.divf %6, %16 : vector<16x32xf32>
    %18 = vector.broadcast %13 : vector<1x32xf32> to vector<16x32xf32>
    %19 = arith.mulf %18, %17 : vector<16x32xf32>
    %c0_7 = arith.constant 0 : index
    %c0_8 = arith.constant 0 : index
    %20 = vector.load %arg2[%c0_7, %c0_8] : memref<1x32xf32, #tpu.memory_space<vmem>>, vector<1x32xf32>
    %21 = vector.broadcast %20 : vector<1x32xf32> to vector<16x32xf32>
    %22 = arith.addf %19, %21 : vector<16x32xf32>
    %c0_9 = arith.constant 0 : index
    %c0_10 = arith.constant 0 : index
    %23 = vector.load %arg3[%c0_9, %c0_10] : memref<16x32xf32, #tpu.memory_space<vmem>>, vector<16x32xf32>
    tpu.vector_store %arg3[%c0_9, %c0_10], %22 {strides = array<i32>} : memref<16x32xf32, #tpu.memory_space<vmem>>, vector<16x32xf32>,
    return
  }
}

</mosaic_0001>

<bundles_post_ra>
// kernel: tpu_custom_call.1
= control target key start
LH: loop header
LB: loop body
LE: loop exit
PB: predicated region body
PF: predicated region fallthrough
CT: control target
= control target key end

     0   :  { %8 = vsyncpa [#allocation3], 0  ;;  %s216_s0 = inlined_call_operand.hbm [shape: f32[16,32], index: 0, kind: input, shape index: {}]   ;;  %s217_s1 = inlined_call_operand.vmem [shape: f32[1,32], index: 1, kind: input, shape index: {}]   ;;  %s218_s2 = inlined_call_operand.vmem [shape: f32[1,32], index: 2, kind: input, shape index: {}]   ;;  %s219_s3 = inlined_call_operand.hbm [shape: f32[16,32], index: 3, kind: output, shape index: {}]  }
   0x1   :  { %9 = vsyncpa [#allocation4], 0  ;;  %s168_s12 = smov [#allocation2]  }
   0x2   :  { %s15_s13 = sshll.u32 %s168_s12, 4  ;;  %s16_s13 = int_to_ptr.vmem [resolvable:$true] %s15_s13 }
   0x3   :  { %s132_s14 = scalar_lea.vmem %s16_s13, 256  ;;  %p137_p1 = scmp.lt.s32.totalorder %s16_s13, %s16_s13 }
   0x4   :  { %p133_p0 = scmp.ne.s32.totalorder %s16_s13, %s132_s14  ;;  %p138_p2 = scmp.lt.s32.totalorder %s132_s14, %s132_s14 }
   0x6   :  { %p139_p3 = por %p138_p2, %p137_p1 }
   0x8   :  { %p140_p4 = pnand %p139_p3, %p133_p0 }
   0xa   :  { %143 = shalt.err (!%p140_p4)
}
   0xb   :  { %s169_s15 = smov 128   ;;  %s170_s16 = smov 8  }
   0xc   :  { %21 = dma.hbm_to_vmem [thread:$0]  %s216_s0, 256, %s16_s13, [#allocation3], %s169_s15, %s169_s15, %s170_s16  }
   0xd   :  { %164 = dma.done.wait [#allocation3], 256  }
   0xe   :  { %165 = vsyncadd [#allocation3], 4294967040  ;;  %vm31_vm0 = vcmask 261120   ;;  %v29_v0 = vld [vmem:[#allocation2] sm:$0xff]  ;;  %v30_v1 = vld [vmem:[#allocation2 + $0x8] sm:$0xff]  ;;  %s171_s22 = smov [#allocation5]  }
   0xf   :  { %v32_v2 = vsel %vm31_vm0, %v29_v0, 0.0  ;;  %v35_v3 = vsel %vm31_vm0, %v30_v1, 0.0  ;;  %v110_v31 = vld [vmem:[%s217_s1] ss:$0 sm:$0xff]  ;;  %s98_s23 = sshll.u32 %s171_s22, 4  ;;  %s99_s23 = int_to_ptr.vmem [resolvable:$true] %s98_s23 }
  0x10   :  { %33 = vadd.xlane.f32.xlu0 %v32_v2  ;;  %v111_v33 = vld [vmem:[%s218_s2] ss:$0 sm:$0xff]  ;;  %s144_s24 = scalar_lea.vmem %s99_s23, 256  ;;  %p149_p6 = scmp.lt.s32.totalorder %s99_s23, %s99_s23 }
  0x11   :  { %p145_p5 = scmp.ne.s32.totalorder %s99_s23, %s144_s24  ;;  %p150_p7 = scmp.lt.s32.totalorder %s144_s24, %s144_s24 }
  0x13   :  { %p151_p8 = por %p150_p7, %p149_p6 }
  0x14   :  { %36 = vadd.xlane.f32.xlu0 %v35_v3 }
  0x15   :  { %p152_p9 = pnand %p151_p8, %p145_p5 }
  0x99   :  { %v34_v4 = vpop.xlane.xlu0 %33 }
  0x9a   :  { %v39_v5 = vmul.f32 0.03125, %v34_v4 }
  0x9c   :  { %v41_v6 = vsub.f32 %v29_v0, %v39_v5 }
  0x9d   :  { %v37_v7 = vpop.xlane.xlu0 %36 }
  0x9e   :  { %v40_v8 = vmul.f32 0.03125, %v37_v7  ;;  %v43_v9 = vmul.f32 %v41_v6, %v41_v6 }
  0xa0   :  { %v42_v10 = vsub.f32 %v30_v1, %v40_v8  ;;  %v45_v11 = vsel %vm31_vm0, %v43_v9, 0.0 }
  0xa1   :  { %46 = vadd.xlane.f32.xlu1 %v45_v11 }
  0xa2   :  { %v44_v12 = vmul.f32 %v42_v10, %v42_v10 }
  0xa4   :  { %v48_v13 = vsel %vm31_vm0, %v44_v12, 0.0 }
  0xa5   :  { %49 = vadd.xlane.f32.xlu1 %v48_v13 }
 0x12a   :  { %v47_v14 = vpop.xlane.xlu1 %46 }
 0x12b   :  { %v51_v15 = vmul.f32 0.032258064, %v47_v14 }
 0x12d   :  { %116 = vrsqrt.f32 %v51_v15  ;;  %vm55_vm1 = vcmp.eq.f32.partialorder %v51_v15, inf  ;;  %v58_v20 = vand.u32 2147483648, %v51_v15  ;;  %vm57_vm2 = vcmp.eq.f32.partialorder %v51_v15, 0.0 }
 0x12e   :  { %v50_v16 = vpop.xlane.xlu1 %49 }
 0x12f   :  { %v52_v17 = vmul.f32 0.032258064, %v50_v16 }
 0x131   :  { %118 = vrsqrt.f32 %v52_v17  ;;  %vm62_vm3 = vcmp.eq.f32.partialorder %v52_v17, inf  ;;  %v65_v26 = vand.u32 2147483648, %v52_v17  ;;  %vm64_vm4 = vcmp.eq.f32.partialorder %v52_v17, 0.0 }
 0x13a   :  { %v117_v18 = vpop.eup %116 }
 0x13b   :  { %v54_v19 = vmul.f32 %v117_v18, %v51_v15 }
 0x13d   :  { %v56_v21 = vsel %vm55_vm1, %v51_v15, %v54_v19 }
 0x13e   :  { %v119_v22 = vpop.eup %118  ;;  %v59_v23 = vsel %vm57_vm2, %v58_v20, %v56_v21 }
 0x13f   :  { %v68_v24 = vadd.f32 1e-06, %v59_v23  ;;  %v61_v25 = vmul.f32 %v119_v22, %v52_v17 }
 0x141   :  { %120 = vrcp.f32 %v68_v24  ;;  %v63_v27 = vsel %vm62_vm3, %v52_v17, %v61_v25 }
 0x142   :  { %v66_v28 = vsel %vm64_vm4, %v65_v26, %v63_v27 }
 0x143   :  { %v69_v29 = vadd.f32 1e-06, %v66_v28 }
 0x145   :  { %122 = vrcp.f32 %v69_v29 }
 0x14e   :  { %v121_v30 = vpop.eup %120 }
 0x14f   :  { %v71_v32 = vmul.f32 %v121_v30, %v41_v6 }
 0x151   :  { %v80_v34 = vmul.f32 %v110_v31, %v71_v32 }
 0x152   :  { %v123_v35 = vpop.eup %122 }
 0x153   :  { %v73_v36 = vmul.f32 %v123_v35, %v42_v10  ;;  %v89_v37 = vadd.f32 %v111_v33, %v80_v34 }
 0x155   :  { %v81_v38 = vmul.f32 %v110_v31, %v73_v36  ;;  %91 = vst.msk [vmem:[#allocation5] sm:$0xff] %vm31_vm0, %v89_v37 }
 0x157   :  { %v90_v39 = vadd.f32 %v111_v33, %v81_v38 }
 0x159   :  { %92 = vst.msk [vmem:[#allocation5 + $0x8] sm:$0xff] %vm31_vm0, %v90_v39 }
 0x15a   :  { %155 = shalt.err (!%p152_p9)
}
 0x15b   :  { %104 = dma.vmem_to_hbm [thread:$0]  %s99_s23, 256, %s219_s3, [#allocation4], %s169_s15, %s169_s15, %s170_s16  }
 0x15c   :  { %166 = dma.done.wait [#allocation4], 256  }
 0x15d   :  { %167 = vsyncadd [#allocation4], 4294967040 }
 0x15e   :  { %108 = vsyncpa [#allocation3], 1 }
 0x15f   :  { %109 = vsyncpa [#allocation4], 1 }

</bundles_post_ra>
